<compile_context>
chip_gen: v7x
topology: tpu7x:2x2x1
jax: 0.10.0
libtpu: 0.0.40
codegen_flags: <defaults>
</compile_context>

<pallas_src>
import jax
import jax.numpy as jnp
from jax.experimental import pallas as pl
from jax.experimental.pallas import tpu as pltpu


def qnet_twin_duel_kernel(xT_ref,
                          w1_ref, b1_ref, w2_ref, b2_ref,       # net_state
                          wa1_ref, ba1_ref, wa2_ref, ba2_ref,   # net_adv1
                          out_ref):
    # x: (state_dim, tb) -- batch on the lane axis.
    x = xT_ref[...].astype(jnp.float32)

    # net_state: Linear -> ReLU -> Linear -> ReLU   (weights are (out, in): y = W @ x + b)
    h = jnp.dot(w1_ref[...], x, preferred_element_type=jnp.float32) + b1_ref[...]
    h = jnp.maximum(h, 0.0)
    t = jnp.dot(w2_ref[...], h, preferred_element_type=jnp.float32) + b2_ref[...]
    t = jnp.maximum(t, 0.0)

    # net_adv1: Linear -> ReLU -> Linear(mid -> action_dim)
    a = jnp.dot(wa1_ref[...], t, preferred_element_type=jnp.float32) + ba1_ref[...]
    a = jnp.maximum(a, 0.0)
    q_adv = jnp.dot(wa2_ref[...], a, preferred_element_type=jnp.float32) + ba2_ref[...]
    # q_adv: (action_dim, tb)

    # argmax over the action axis (sublanes), first occurrence, written lane-dense as (1, tb).
    # Equivalent to softmax(q_val + q_adv - q_adv.mean(dim=1)).argmax(dim=1) of the module:
    # the val branch / mean offset are uniform over actions and softmax is monotone.
    q_max = jnp.max(q_adv, axis=0, keepdims=True)                   # (1, tb)
    row = jax.lax.broadcasted_iota(jnp.int32, q_adv.shape, 0)       # action index per sublane
    cand = jnp.where(q_adv >= q_max, row, q_adv.shape[0])
    out_ref[...] = jnp.min(cand, axis=0, keepdims=True).astype(jnp.int32)


def qnet_twin_duel_forward(state, params, *, batch_tile=None):
    """state: (B, state_dim). Returns int32 (B,) actions == QNetTwinDuel.forward(state)."""
    (w1, b1, w2, b2, wv1, bv1, wv2, bv2, wa1, ba1, wa2, ba2) = params
    B, S = state.shape
    # Only the adv path affects the argmax output (see kernel comment).
    kparams = (w1, b1, w2, b2, wa1, ba1, wa2, ba2)

    if batch_tile is None:
        # Prefer 128-row tiles: >=2 grid steps for B>=256 (pipelining + v7x megacore),
        # intermediates stay comfortably within the vreg budget.
        tb = next((t for t in (128, 256) if B % t == 0), B)
    else:
        tb = batch_tile
    assert B % tb == 0, "batch must be divisible by batch_tile"
    grid = (B // tb,)

    xT = state.T  # (S, B): batch on the lane axis inside the kernel.

    def resident(arr):  # whole (tiny) param array, constant block -> stays in VMEM
        return pl.BlockSpec(arr.shape, lambda i: (0,) * arr.ndim)

    in_specs = [pl.BlockSpec((S, tb), lambda i: (0, i))] + [resident(p) for p in kparams]
    out_spec = pl.BlockSpec((1, tb), lambda i: (0, i))  # lane-dense int32 output row

    out = pl.pallas_call(
        qnet_twin_duel_kernel,
        out_shape=jax.ShapeDtypeStruct((1, B), jnp.int32),
        grid_spec=pltpu.PrefetchScalarGridSpec(
            num_scalar_prefetch=0,
            grid=grid,
            in_specs=in_specs,
            out_specs=out_spec,
        ),
        compiler_params=pltpu.CompilerParams(
            dimension_semantics=("parallel",)),
    )(xT, *kparams)
    return out[0]  # (B,) int32, matches torch .argmax(dim=1)


def init_params(key, state_dim, mid_dim, action_dim):
    """PyTorch-style Linear params: W is (out, in), b is (out, 1). f32, deterministic.
    (net_val2 / net_adv2 exist in the module but are never used by forward(), so omitted.)"""
    ks = jax.random.split(key, 12)

    def lin(kw, kb, fan_in, fan_out):
        lim = 1.0 / jnp.sqrt(jnp.float32(fan_in))
        w = jax.random.uniform(kw, (fan_out, fan_in), jnp.float32, -lim, lim)
        b = jax.random.uniform(kb, (fan_out, 1), jnp.float32, -lim, lim)
        return w, b

    w1, b1 = lin(ks[0], ks[1], state_dim, mid_dim)
    w2, b2 = lin(ks[2], ks[3], mid_dim, mid_dim)
    wv1, bv1 = lin(ks[4], ks[5], mid_dim, mid_dim)
    wv2, bv2 = lin(ks[6], ks[7], mid_dim, 1)
    wa1, ba1 = lin(ks[8], ks[9], mid_dim, mid_dim)
    wa2, ba2 = lin(ks[10], ks[11], mid_dim, action_dim)
    return (w1, b1, w2, b2, wv1, bv1, wv2, bv2, wa1, ba1, wa2, ba2)


def reference_forward(state, params):
    """Full-fidelity pure-JAX reference of QNetTwinDuel.forward (val branch, dueling
    combine, softmax, argmax), f32 math, feature-major layout."""
    (w1, b1, w2, b2, wv1, bv1, wv2, bv2, wa1, ba1, wa2, ba2) = params
    xT = state.astype(jnp.float32).T                        # (S, B)
    t = jnp.maximum(w1 @ xT + b1, 0.0)
    t = jnp.maximum(w2 @ t + b2, 0.0)
    v = jnp.maximum(wv1 @ t + bv1, 0.0)
    q_val = wv2 @ v + bv2                                   # (1, B)
    a = jnp.maximum(wa1 @ t + ba1, 0.0)
    q_adv = wa2 @ a + ba2                                   # (A, B)
    q = q_val + q_adv - jnp.mean(q_adv, axis=0, keepdims=True)
    p = jax.nn.softmax(q, axis=0)
    return jnp.argmax(p, axis=0).astype(jnp.int32)          # (B,)


if __name__ == "__main__":
    batch, state_dim, mid_dim, action_dim = 256, 16, 32, 8  # -> tile 128, grid=(2,)

    key = jax.random.PRNGKey(0)
    k_state, k_params = jax.random.split(key)
    # The streamed activation is provided in bf16 (halves its HBM traffic); all compute is f32.
    state = jax.random.normal(k_state, (batch, state_dim), jnp.float32).astype(jnp.bfloat16)
    params = init_params(k_params, state_dim, mid_dim, action_dim)

    actions = qnet_twin_duel_forward(state, params)
    actions = jax.block_until_ready(actions)

    ref = reference_forward(state, params)
    assert actions.shape == (batch,)
    assert actions.dtype == jnp.int32
    assert bool(jnp.all(actions == ref))

    print("KERNEL_OK")
</pallas_src>

<mosaic_0001>
module attributes {stable_mosaic.version = 11 : i64} {
  func.func @qnet_twin_duel_kernel(%arg0: i32, %arg1: memref<16x128xbf16, #tpu.memory_space<vmem>>, %arg2: memref<32x16xf32, #tpu.memory_space<vmem>>, %arg3: memref<32x1xf32, #tpu.memory_space<vmem>>, %arg4: memref<32x32xf32, #tpu.memory_space<vmem>>, %arg5: memref<32x1xf32, #tpu.memory_space<vmem>>, %arg6: memref<32x32xf32, #tpu.memory_space<vmem>>, %arg7: memref<32x1xf32, #tpu.memory_space<vmem>>, %arg8: memref<8x32xf32, #tpu.memory_space<vmem>>, %arg9: memref<8x1xf32, #tpu.memory_space<vmem>>, %arg10: memref<1x128xi32, #tpu.memory_space<vmem>>) attributes {dimension_semantics = [#tpu.dimension_semantics<parallel>], iteration_bounds = array<i64: 2>, scalar_prefetch = 0 : i64, scratch_operands = 0 : i64, tpu.core_type = #tpu.core_type<tc>, window_params = [{transform_indices = @transform_0, window_bounds = array<i64: 16, 128>}, {pipeline_mode = #tpu.pipeline_mode<synchronous>, transform_indices = @transform_1, window_bounds = array<i64: 32, 16>}, {pipeline_mode = #tpu.pipeline_mode<synchronous>, transform_indices = @transform_2, window_bounds = array<i64: 32, 1>}, {pipeline_mode = #tpu.pipeline_mode<synchronous>, transform_indices = @transform_3, window_bounds = array<i64: 32, 32>}, {pipeline_mode = #tpu.pipeline_mode<synchronous>, transform_indices = @transform_4, window_bounds = array<i64: 32, 1>}, {pipeline_mode = #tpu.pipeline_mode<synchronous>, transform_indices = @transform_5, window_bounds = array<i64: 32, 32>}, {pipeline_mode = #tpu.pipeline_mode<synchronous>, transform_indices = @transform_6, window_bounds = array<i64: 32, 1>}, {pipeline_mode = #tpu.pipeline_mode<synchronous>, transform_indices = @transform_7, window_bounds = array<i64: 8, 32>}, {pipeline_mode = #tpu.pipeline_mode<synchronous>, transform_indices = @transform_8, window_bounds = array<i64: 8, 1>}, {transform_indices = @transform_9, window_bounds = array<i64: 1, 128>}]} {
    %c0 = arith.constant 0 : index
    %c0_0 = arith.constant 0 : index
    %0 = vector.load %arg1[%c0, %c0_0] : memref<16x128xbf16, #tpu.memory_space<vmem>>, vector<16x128xbf16>
    %1 = arith.extf %0 : vector<16x128xbf16> to vector<16x128xf32>
    %c0_1 = arith.constant 0 : index
    %c0_2 = arith.constant 0 : index
    %2 = vector.load %arg2[%c0_1, %c0_2] : memref<32x16xf32, #tpu.memory_space<vmem>>, vector<32x16xf32>
    %cst = arith.constant dense<0.000000e+00> : vector<32x128xf32>
    %3 = tpu.matmul %2, %1, %cst {dimension_numbers = #tpu.dot_dimension_numbers<[1], [0], [0], [1], [0, 0, 1, 1], [], []>} : vector<32x16xf32>, vector<16x128xf32>, vector<32x128xf32> -> vector<32x128xf32>
    %c0_3 = arith.constant 0 : index
    %c0_4 = arith.constant 0 : index
    %4 = vector.load %arg3[%c0_3, %c0_4] : memref<32x1xf32, #tpu.memory_space<vmem>>, vector<32x1xf32>
    %5 = vector.broadcast %4 : vector<32x1xf32> to vector<32x128xf32>
    %6 = arith.addf %3, %5 : vector<32x128xf32>
    %cst_5 = arith.constant 0.000000e+00 : f32
    %7 = vector.broadcast %cst_5 : f32 to vector<32x128xf32>
    %8 = arith.maximumf %6, %7 : vector<32x128xf32>
    %c0_6 = arith.constant 0 : index
    %c0_7 = arith.constant 0 : index
    %9 = vector.load %arg4[%c0_6, %c0_7] : memref<32x32xf32, #tpu.memory_space<vmem>>, vector<32x32xf32>
    %cst_8 = arith.constant dense<0.000000e+00> : vector<32x128xf32>
    %10 = tpu.matmul %9, %8, %cst_8 {dimension_numbers = #tpu.dot_dimension_numbers<[1], [0], [0], [1], [0, 0, 1, 1], [], []>} : vector<32x32xf32>, vector<32x128xf32>, vector<32x128xf32> -> vector<32x128xf32>
    %c0_9 = arith.constant 0 : index
    %c0_10 = arith.constant 0 : index
    %11 = vector.load %arg5[%c0_9, %c0_10] : memref<32x1xf32, #tpu.memory_space<vmem>>, vector<32x1xf32>
    %12 = vector.broadcast %11 : vector<32x1xf32> to vector<32x128xf32>
    %13 = arith.addf %10, %12 : vector<32x128xf32>
    %cst_11 = arith.constant 0.000000e+00 : f32
    %14 = vector.broadcast %cst_11 : f32 to vector<32x128xf32>
    %15 = arith.maximumf %13, %14 : vector<32x128xf32>
    %c0_12 = arith.constant 0 : index
    %c0_13 = arith.constant 0 : index
    %16 = vector.load %arg6[%c0_12, %c0_13] : memref<32x32xf32, #tpu.memory_space<vmem>>, vector<32x32xf32>
    %cst_14 = arith.constant dense<0.000000e+00> : vector<32x128xf32>
    %17 = tpu.matmul %16, %15, %cst_14 {dimension_numbers = #tpu.dot_dimension_numbers<[1], [0], [0], [1], [0, 0, 1, 1], [], []>} : vector<32x32xf32>, vector<32x128xf32>, vector<32x128xf32> -> vector<32x128xf32>
    %c0_15 = arith.constant 0 : index
    %c0_16 = arith.constant 0 : index
    %18 = vector.load %arg7[%c0_15, %c0_16] : memref<32x1xf32, #tpu.memory_space<vmem>>, vector<32x1xf32>
    %19 = vector.broadcast %18 : vector<32x1xf32> to vector<32x128xf32>
    %20 = arith.addf %17, %19 : vector<32x128xf32>
    %cst_17 = arith.constant 0.000000e+00 : f32
    %21 = vector.broadcast %cst_17 : f32 to vector<32x128xf32>
    %22 = arith.maximumf %20, %21 : vector<32x128xf32>
    %c0_18 = arith.constant 0 : index
    %c0_19 = arith.constant 0 : index
    %23 = vector.load %arg8[%c0_18, %c0_19] : memref<8x32xf32, #tpu.memory_space<vmem>>, vector<8x32xf32>
    %cst_20 = arith.constant dense<0.000000e+00> : vector<8x128xf32>
    %24 = tpu.matmul %23, %22, %cst_20 {dimension_numbers = #tpu.dot_dimension_numbers<[1], [0], [0], [1], [0, 0, 1, 1], [], []>} : vector<8x32xf32>, vector<32x128xf32>, vector<8x128xf32> -> vector<8x128xf32>
    %c0_21 = arith.constant 0 : index
    %c0_22 = arith.constant 0 : index
    %25 = vector.load %arg9[%c0_21, %c0_22] : memref<8x1xf32, #tpu.memory_space<vmem>>, vector<8x1xf32>
    %26 = vector.broadcast %25 : vector<8x1xf32> to vector<8x128xf32>
    %27 = arith.addf %24, %26 : vector<8x128xf32>
    %cst_23 = arith.constant dense<0xFF800000> : vector<128xf32>
    %28 = vector.multi_reduction <maximumf>, %27, %cst_23 [0] : vector<8x128xf32> to vector<128xf32>
    %29 = vector.shape_cast %28 : vector<128xf32> to vector<1x128xf32>
    %30 = tpu.iota {dimensions = array<i32: 0>} : vector<8x128xi32>
    %31 = vector.broadcast %29 : vector<1x128xf32> to vector<8x128xf32>
    %32 = arith.cmpf oge, %27, %31 : vector<8x128xf32>
    %c8_i32 = arith.constant 8 : i32
    %33 = vector.broadcast %c8_i32 : i32 to vector<8x128xi32>
    %34 = arith.select %32, %30, %33 : vector<8x128xi1>, vector<8x128xi32>
    %cst_24 = arith.constant dense<2147483647> : vector<128xi32>
    %35 = vector.multi_reduction <minsi>, %34, %cst_24 [0] : vector<8x128xi32> to vector<128xi32>
    %36 = vector.shape_cast %35 : vector<128xi32> to vector<1x128xi32>
    %c0_25 = arith.constant 0 : index
    %c0_26 = arith.constant 0 : index
    %37 = vector.load %arg10[%c0_25, %c0_26] : memref<1x128xi32, #tpu.memory_space<vmem>>, vector<1x128xi32>
    tpu.vector_store %arg10[%c0_25, %c0_26], %36 {strides = array<i32>} : memref<1x128xi32, #tpu.memory_space<vmem>>, vector<1x128xi32>,
    return
  }
  func.func @transform_0(%arg0: i32) -> (i32, i32) {
    %c0_i32 = arith.constant 0 : i32
    %c0_i32_0 = arith.constant 0 : i32
    return %c0_i32, %arg0 : i32, i32
  }
  func.func @transform_1(%arg0: i32) -> (i32, i32) {
    %c0_i32 = arith.constant 0 : i32
    %c0_i32_0 = arith.constant 0 : i32
    %c0_i32_1 = arith.constant 0 : i32
    return %c0_i32, %c0_i32_0 : i32, i32
  }
  func.func @transform_2(%arg0: i32) -> (i32, i32) {
    %c0_i32 = arith.constant 0 : i32
    %c0_i32_0 = arith.constant 0 : i32
    %c0_i32_1 = arith.constant 0 : i32
    return %c0_i32, %c0_i32_0 : i32, i32
  }
  func.func @transform_3(%arg0: i32) -> (i32, i32) {
    %c0_i32 = arith.constant 0 : i32
    %c0_i32_0 = arith.constant 0 : i32
    %c0_i32_1 = arith.constant 0 : i32
    return %c0_i32, %c0_i32_0 : i32, i32
  }
  func.func @transform_4(%arg0: i32) -> (i32, i32) {
    %c0_i32 = arith.constant 0 : i32
    %c0_i32_0 = arith.constant 0 : i32
    %c0_i32_1 = arith.constant 0 : i32
    return %c0_i32, %c0_i32_0 : i32, i32
  }
  func.func @transform_5(%arg0: i32) -> (i32, i32) {
    %c0_i32 = arith.constant 0 : i32
    %c0_i32_0 = arith.constant 0 : i32
    %c0_i32_1 = arith.constant 0 : i32
    return %c0_i32, %c0_i32_0 : i32, i32
  }
  func.func @transform_6(%arg0: i32) -> (i32, i32) {
    %c0_i32 = arith.constant 0 : i32
    %c0_i32_0 = arith.constant 0 : i32
    %c0_i32_1 = arith.constant 0 : i32
    return %c0_i32, %c0_i32_0 : i32, i32
  }
  func.func @transform_7(%arg0: i32) -> (i32, i32) {
    %c0_i32 = arith.constant 0 : i32
    %c0_i32_0 = arith.constant 0 : i32
    %c0_i32_1 = arith.constant 0 : i32
    return %c0_i32, %c0_i32_0 : i32, i32
  }
  func.func @transform_8(%arg0: i32) -> (i32, i32) {
    %c0_i32 = arith.constant 0 : i32
    %c0_i32_0 = arith.constant 0 : i32
    %c0_i32_1 = arith.constant 0 : i32
    return %c0_i32, %c0_i32_0 : i32, i32
  }
  func.func @transform_9(%arg0: i32) -> (i32, i32) {
    %c0_i32 = arith.constant 0 : i32
    %c0_i32_0 = arith.constant 0 : i32
    return %c0_i32, %arg0 : i32, i32
  }
}

</mosaic_0001>

<bundles_post_ra>
// kernel: tpu_custom_call.1
= control target key start
LH: loop header
LB: loop body
LE: loop exit
PB: predicated region body
PF: predicated region fallthrough
CT: control target
= control target key end

     0   :  { %14 = vsyncpa [#allocation4], 0  ;;  %s1436_s0 = inlined_call_operand.vmem [shape: bf16[16,256], index: 0, kind: input, shape index: {}]   ;;  %s1437_s1 = inlined_call_operand.vmem [shape: f32[32,16], index: 1, kind: input, shape index: {}]   ;;  %s1438_s2 = inlined_call_operand.vmem [shape: f32[32,1], index: 2, kind: input, shape index: {}]   ;;  %s1439_s3 = inlined_call_operand.vmem [shape: f32[32,32], index: 3, kind: input, shape index: {}]   ;;  %s1440_s4 = inlined_call_operand.vmem [shape: f32[32,1], index: 4, kind: input, shape index: {}]   ;;  %s1441_s5 = inlined_call_operand.vmem [shape: f32[32,32], index: 5, kind: input, shape index: {}]   ;;  %s1442_s6 = inlined_call_operand.vmem [shape: f32[32,1], index: 6, kind: input, shape index: {}]   ;;  %s1443_s7 = inlined_call_operand.vmem [shape: f32[8,32], index: 7, kind: input, shape index: {}]   ;;  %s1444_s8 = inlined_call_operand.vmem [shape: f32[8,1], index: 8, kind: input, shape index: {}]   ;;  %s1445_s9 = inlined_call_operand.hbm [shape: s32[1,256], index: 9, kind: output, shape index: {}]  }
   0x1   :  { %16 = vsyncpa [#allocation4 + $0x1], 0  ;;  %s1235_s30 = smov 0   ;;  %s1237_s10 = smov 0  }
   0x2   :  { %s1239_s11 = smov 0   ;;  %s1241_s12 = smov 0  }
   0x3 LB: > { %s941_s13 = sadd.s32 4294967295, %s1178_s12   ;;  %s942_s14 = sadd.s32 4294967294, %s1178_s12   ;;  %s1178_s12 = sphi %s1241_s12, %s1451_s12   ;;  %s1174_s11 = sphi %s1239_s11, %s1450_s11   ;;  %s1170_s10 = sphi %s1237_s10, %s1449_s10   ;;  %s1166_s30 = sphi %s1235_s30, %s1448_s30  }
   0x4   : > { %s1258_s15 = sadd.s32 1, %s1178_s12   ;;  %s29_s16 = sadd.s32 1, %s1174_s11 }
   0x5   : > { %s26_s17 = ssub.s32 %s1178_s12, %s1258_s15  ;;  %p36_p0 = scmp.ne.s32.totalorder %s1174_s11, %s1170_s10 }
   0x6   : > { %p27_p1 = scmp.eq.s32.totalorder %s26_s17, 0  ;;  %p37_p2 = scmp.eq.s32.totalorder %s1178_s12, 0 }
   0x7   : > { %p234_p3 = scmp.eq.s32.totalorder %s941_s13, 1  ;;  %p239_p4 = scmp.ne.s32.totalorder %s1170_s10, %s1166_s30 }
   0x8   : > { %s1271_s18 = scalar_select %p27_p1, %s1174_s11, %s29_s16  }
   0x9   : > { %p38_p5 = por %p37_p2, %p36_p0  ;;  %p1273_p6 = por %p234_p3, %p36_p0 }
   0xa   : > { %p240_p7 = scmp.eq.s32.totalorder %s942_s14, 1  ;;  %p944_p9 = scmp.ge.s32.totalorder %s1178_s12, 2 }
   0xc   : > { %p1277_p8 = por %p240_p7, %p239_p4  ;;  %280 = sbr.rel (%p944_p9) target bundleno = 26 (0x1a), region = 48 }
  0x13   : > { %283 = sbr.rel (!%p38_p5) target bundleno = 26 (0x1a), region = 52  ;;  %s285_s21 = sand.u32 (%p38_p5), 1, %s1174_s11  }
  0x14   : > { %s946_s22 = sshll.u32 (%p38_p5), %s1178_s12, 2  ;;  %s945_s23 = sshll.u32 (%p38_p5), %s285_s21, 3 }
  0x15   : > { %s289_s26 = scalar_lea.vmem (%p38_p5), %s1436_s0, %s946_s22  ;;  %s287_s27 = scalar_lea.vmem (%p38_p5), [#allocation2], %s945_s23 }
  0x16   : > { %v305_v0 = vld [vmem:[%s289_s26] sm:$0xf] (%p38_p5)  ;;  %v307_v1 = vld [vmem:[%s289_s26 + $0x8] sm:$0xf] (%p38_p5) }
  0x17   : > { %306 = vst [vmem:[%s287_s27] sm:$0xf] (%p38_p5), %v305_v0  ;;  %308 = vst [vmem:[%s287_s27 + $0x4] sm:$0xf] (%p38_p5), %v307_v1 }
  0x1a PF: > { %p947_p10 = scmp.ge.s32.totalorder %s1178_s12, 1  ;;  %p334_p11 = scmp.lt.s32.totalorder %s1178_s12, 3 }
  0x1c   : > { %p335_p12 = pnand %p947_p10, %p334_p11 }
  0x1d   : > { %s1292_s28 = sand.u32 (!%p335_p12), 1, %s1170_s10   ;;  %v379_v2 = vld [vmem:[%s1437_s1] sm:$0xff] (!%p335_p12)  ;;  %vm407_vm0 = vcmask (!%p335_p12), 130048   ;;  %v1180_v3 = vmov (!%p335_p12), 0   ;;  %v385_v5 = vld [vmem:[%s1438_s2 + $0x10] sm:$0xff] (!%p335_p12)  ;;  %v384_v7 = vld [vmem:[%s1438_s2 + $0x8] sm:$0xff] (!%p335_p12) }
  0x1e   : > { %338 = sbr.rel (%p335_p12) target bundleno = 971 (0x3cb), region = 93  ;;  %s948_s16 = sshll.u32 (!%p335_p12), %s1292_s28, 3  ;;  %1000 = vmatprep.mubr.msk.f32.mxu0 (!%p335_p12), %vm407_vm0, %v379_v2  ;;  %1114 = vset.pattern.permute.xlu0 (!%p335_p12), %v1180_v3  ;;  %v383_v4 = vld [vmem:[%s1438_s2] sm:$0xff] (!%p335_p12)  ;;  %v386_v8 = vld [vmem:[%s1438_s2 + $0x18] sm:$0xff] (!%p335_p12)  ;;  %v380_v9 = vld [vmem:[%s1437_s1 + $0x8] sm:$0xff] (!%p335_p12)  ;;  %vm537_vm1 = vcmask (!%p335_p12), 261120  }
  0x1f   : > { %389 = vperm.xlu0 (!%p335_p12), %1114, %v383_v4   ;;  %1115 = vset.pattern.permute.xlu1 (!%p335_p12), %v1180_v3  ;;  %s343_s24 = scalar_lea.vmem (!%p335_p12), [#allocation2], %s948_s16  ;;  %v381_v10 = vld [vmem:[%s1437_s1 + $0x10] sm:$0xff] (!%p335_p12)  ;;  %v513_v11 = vld [vmem:[%s1440_s4] sm:$0xff] (!%p335_p12)  ;;  %v514_v12 = vld [vmem:[%s1440_s4 + $0x8] sm:$0xff] (!%p335_p12)  ;;  %v1181_v1 = vmov (!%p335_p12), 0.0|0.0   ;;  %vm1182_vm2 = vmmov (!%p335_p12), 0  }
  0x20   : > { %v966_v6 = vld [vmem:[%s343_s24] sm:$0xff] (!%p335_p12)   ;;  %399 = vperm.xlu1 (!%p335_p12), %1115, %v385_v5   ;;  %v382_v13 = vld [vmem:[%s1437_s1 + $0x18] sm:$0xff] (!%p335_p12)  ;;  %v515_v14 = vld [vmem:[%s1440_s4 + $0x10] sm:$0xff] (!%p335_p12)  ;;  %v1183_v2 = vmov (!%p335_p12), 0.0   ;;  %s962_s27 = sshll.u32 (!%p335_p12), %s941_s13, 4  ;;  %s374_s29 = scalar_lea.vmem (!%p335_p12), [#allocation3], %s1292_s28 }
  0x21   : > { %1046 = vmatprep.subr.bf16.mxu0 (!%p335_p12), %v966_v6  ;;  %v516_v15 = vld [vmem:[%s1440_s4 + $0x18] sm:$0xff] (!%p335_p12)  ;;  %v643_v16 = vld [vmem:[%s1442_s6] sm:$0xff] (!%p335_p12)  ;;  %v644_v17 = vld [vmem:[%s1442_s6 + $0x8] sm:$0xff] (!%p335_p12)  ;;  %s881_s14 = sshll.u32 (!%p335_p12), %s374_s29, 4  ;;  %s1392_s22 = scalar_lea.hbm (!%p335_p12), %s1445_s9, %s962_s27  ;;  %s1394_s14 = int_to_ptr.vmem [resolvable:$true] %s881_s14 }
  0x22   : > { %1048 = vmatpush3.bf16.msra.mxu0 (!%p335_p12), %v966_v6  ;;  %v645_v18 = vld [vmem:[%s1442_s6 + $0x10] sm:$0xff] (!%p335_p12)  ;;  %v646_v19 = vld [vmem:[%s1442_s6 + $0x18] sm:$0xff] (!%p335_p12)  ;;  %v769_v20 = vld [vmem:[%s1444_s8] sm:$0xff] (!%p335_p12)  ;;  %s869_s16 = scalar_lea.sflag (!%p335_p12), [#allocation4], %s1292_s28  ;;  %s1116_s23 = scalar_lea.vmem (!%p335_p12), %s1394_s14, 16 }
  0x23   : > { %394 = vperm.xlu0 (!%p335_p12), %1114, %v384_v7   ;;  %v509_v21 = vld [vmem:[%s1439_s3] sm:$0xff] (!%p335_p12)  ;;  %v510_v40 = vld [vmem:[%s1439_s3 + $0x8] sm:$0xff] (!%p335_p12)  ;;  %v511_v41 = vld [vmem:[%s1439_s3 + $0x10] sm:$0xff] (!%p335_p12)  ;;  %p1117_p13 = scmp.ne.s32.totalorder (!%p335_p12), %s1394_s14, %s1116_s23  ;;  %s1184_s13 = smov (!%p335_p12), [#allocation3]  }
  0x24   : > { %404 = vperm.xlu1 (!%p335_p12), %1115, %v386_v8   ;;  %1014 = vmatprep.mubr.msk.f32.mxu1 (!%p335_p12), %vm537_vm1, %v509_v21  ;;  %v512_v42 = vld [vmem:[%s1439_s3 + $0x18] sm:$0xff] (!%p335_p12)  ;;  %v639_v43 = vld [vmem:[%s1441_s5] sm:$0xff] (!%p335_p12)  ;;  %v640_v62 = vld [vmem:[%s1441_s5 + $0x8] sm:$0xff] (!%p335_p12)  ;;  %s1120_s24 = sshll.u32 (!%p335_p12), %s1184_s13, 4  ;;  %s1121_s24 = int_to_ptr.vmem [resolvable:$false] %s1120_s24 }
  0x25   : > { %1001 = vmatmul.mubr.msk.f32.vlgmr.msra.gmra.mrb[0].mxu0 %vm407_vm0, %v380_v9  ;;  %v641_v63 = vld [vmem:[%s1441_s5 + $0x10] sm:$0xff]  ;;  %v642_v0 = vld [vmem:[%s1441_s5 + $0x18] sm:$0xff]  ;;  %v768_v21 = vld [vmem:[%s1443_s7] sm:$0xff]  ;;  %p1118_p0 = pnand %p1117_p13, %p1273_p6  ;;  %s1122_s25 = scalar_lea.vmem %s1121_s24, 32 }
  0x26   : > { %1003 = vmatprep.mubr.msk.f32.mxu0 %vm407_vm0, %v381_v10  ;;  %p1123_p2 = scmp.lt.s32.totalorder %s1394_s14, %s1121_s24  ;;  %p1124_p3 = scmp.lt.s32.totalorder %s1122_s25, %s1116_s23 }
  0x27   : > { %519 = vperm.xlu0 %1114, %v513_v11   ;;  %p1119_p1 = pneg %p1118_p0 }
  0x28   : > { %524 = vperm.xlu1 %1115, %v514_v12   ;;  %p1125_p4 = por %p1124_p3, %p1123_p2 }
  0x29   : > { %1004 = vmatmul.mubr.msk.f32.gmra.mrb[2].mxu0 %vm407_vm0, %v382_v13 }
  0x2a   : > { %1028 = vmatprep.mubr.msk.f32.mxu0 %vm537_vm1, %v639_v43  ;;  %p1126_p5 = pnand %p1125_p4, %p1119_p1 }
  0x2b   : > { %529 = vperm.xlu0 %1114, %v515_v14  }
  0x2c   : > { %534 = vperm.xlu1 %1115, %v516_v15  }
  0x2f   : > { %649 = vperm.xlu0 %1114, %v643_v16  }
  0x30   : > { %654 = vperm.xlu1 %1115, %v644_v17  }
  0x33   : > { %659 = vperm.xlu0 %1114, %v645_v18  }
  0x34   : > { %664 = vperm.xlu1 %1115, %v646_v19  }
  0x37   : > { %772 = vperm.xlu0 %1114, %v769_v20  }
  0x9e   : > { %v390_v22 = vpop.permute.xlu0 %389 }
  0x9f   : > { %v400_v23 = vpop.permute.xlu1 %399 }
  0xa2   : > { %v395_v24 = vpop.permute.xlu0 %394 }
  0xa3   : > { %v405_v30 = vpop.permute.xlu1 %404 }
  0xa6   : > { %v520_v45 = vpop.permute.xlu0 %519 }
  0xa7   : > { %v525_v44 = vpop.permute.xlu1 %524 }
  0xaa   : > { %v530_v54 = vpop.permute.xlu0 %529 }
  0xab   : > { %v535_v51 = vpop.permute.xlu1 %534 }
  0xae   : > { %v650_v4 = vpop.permute.xlu0 %649 }
  0xaf   : > { %v655_v3 = vpop.permute.xlu1 %654 }
  0xb2   : > { %v660_v13 = vpop.permute.xlu0 %659 }
  0xb3   : > { %v665_v10 = vpop.permute.xlu1 %664 }
  0xf8   : > { %v1002_v25 = vpop.f32.mrb[0].mxu0 }
  0xf9   : > { %v492_v26 = vadd.f32 %v1002_v25, %v395_v24  ;;  %v486_v27 = vpop.f32.mrb[1].mxu0 }
  0xfa   : > { %v487_v28 = vadd.f32 %v486_v27, %v390_v22  ;;  %v773_v22 = vpop.permute.xlu0 %772 }
  0xfb   : > { %v506_v29 = vmax.f32 %v492_v26, 0.0 }
  0xfc   : > { %v505_v31 = vmax.f32 %v487_v28, 0.0  ;;  %v1005_v32 = vpop.f32.mrb[2].mxu0 }
  0xfd   : > { %v502_v33 = vadd.f32 %v1005_v32, %v405_v30  ;;  %v496_v34 = vpop.f32.mrb[3].mxu0 }
  0xfe   : > { %v497_v35 = vadd.f32 %v496_v34, %v400_v23  ;;  %v1049_v36 = vpack.c.bf16 %v506_v29, %v505_v31  ;;  %v854_v29 = vlaneseq }
  0xff   : > { %v508_v37 = vmax.f32 %v502_v33, 0.0 }
 0x100   : > { %v507_v38 = vmax.f32 %v497_v35, 0.0  ;;  %1050 = vmatprep.subr.bf16.mxu1 %v1049_v36  ;;  %v855_v32 = vshrl.u32 %v854_v29, 7 }
 0x101   : > { %1052 = vmatpush3.bf16.msra.mxu1 %v1049_v36 }
 0x102   : > { %v1053_v39 = vpack.c.bf16 %v508_v37, %v507_v38 }
 0x104   : > { %1054 = vmatprep.subr.bf16.mxu1 %v1053_v39 }
 0x105   : > { %1056 = vmatpush3.bf16.msra.mxu1 %v1053_v39 }
 0x106   : > { %1065 = vmatprep.subr.bf16.mxu1 %v1181_v1 }
 0x108   : > { %1015 = vmatmul.mubr.msk.f32.vlgmr.msra.gmra.mrb[0].mxu1 %vm537_vm1, %v510_v40 }
 0x109   : > { %1017 = vmatprep.mubr.msk.f32.mxu1 %vm537_vm1, %v511_v41 }
 0x10c   : > { %1018 = vmatmul.mubr.msk.f32.gmra.mrb[2].mxu1 %vm537_vm1, %v512_v42 }
 0x10d   : > { %1042 = vmatprep.mubr.msk.f32.mxu1 %vm1182_vm2, %v1183_v2 }
 0x1db   : > { %v1016_v46 = vpop.f32.mrb[0].mxu1 }
 0x1dc   : > { %v622_v47 = vadd.f32 %v1016_v46, %v525_v44  ;;  %v616_v48 = vpop.f32.mrb[1].mxu1 }
 0x1dd   : > { %v617_v49 = vadd.f32 %v616_v48, %v520_v45 }
 0x1de   : > { %v636_v50 = vmax.f32 %v622_v47, 0.0 }
 0x1df   : > { %v635_v52 = vmax.f32 %v617_v49, 0.0  ;;  %v1019_v53 = vpop.f32.mrb[2].mxu1 }
 0x1e0   : > { %v632_v55 = vadd.f32 %v1019_v53, %v535_v51  ;;  %v626_v56 = vpop.f32.mrb[3].mxu1 }
 0x1e1   : > { %v1057_v57 = vpack.c.bf16 %v636_v50, %v635_v52  ;;  %v627_v58 = vadd.f32 %v626_v56, %v530_v54 }
 0x1e2   : > { %v638_v59 = vmax.f32 %v632_v55, 0.0 }
 0x1e3   : > { %v637_v60 = vmax.f32 %v627_v58, 0.0  ;;  %1058 = vmatprep.subr.bf16.mxu0 %v1057_v57 }
 0x1e4   : > { %1060 = vmatpush3.bf16.msra.mxu0 %v1057_v57 }
 0x1e5   : > { %v1061_v61 = vpack.c.bf16 %v638_v59, %v637_v60 }
 0x1e7   : > { %1062 = vmatprep.subr.bf16.mxu0 %v1061_v61 }
 0x1e8   : > { %1064 = vmatpush3.bf16.msra.mxu0 %v1061_v61 }
 0x1eb   : > { %1029 = vmatmul.mubr.msk.f32.vlgmr.msra.gmra.mrb[4].mxu0 %vm537_vm1, %v640_v62 }
 0x1ec   : > { %1031 = vmatprep.mubr.msk.f32.mxu0 %vm537_vm1, %v641_v63 }
 0x1ef   : > { %1032 = vmatmul.mubr.msk.f32.gmra.mrb[6].mxu0 %vm537_vm1, %v642_v0 }
 0x2be   : > { %v1030_v5 = vpop.f32.mrb[4].mxu0 }
 0x2bf   : > { %v751_v6 = vadd.f32 %v1030_v5, %v655_v3  ;;  %v745_v7 = vpop.f32.mrb[5].mxu0 }
 0x2c0   : > { %v746_v8 = vadd.f32 %v745_v7, %v650_v4 }
 0x2c1   : > { %v765_v9 = vmax.f32 %v751_v6, 0.0 }
 0x2c2   : > { %v764_v11 = vmax.f32 %v746_v8, 0.0  ;;  %v1033_v12 = vpop.f32.mrb[6].mxu0 }
 0x2c3   : > { %v761_v14 = vadd.f32 %v1033_v12, %v665_v10  ;;  %v755_v15 = vpop.f32.mrb[7].mxu0 }
 0x2c4   : > { %v1066_v16 = vpack.c.bf16 %v765_v9, %v764_v11  ;;  %v756_v17 = vadd.f32 %v755_v15, %v660_v13 }
 0x2c5   : > { %v767_v18 = vmax.f32 %v761_v14, 0.0 }
 0x2c6   : > { %v766_v19 = vmax.f32 %v756_v17, 0.0  ;;  %1067 = vmatpush3.bf16.msra.mxu1 %v1066_v16 }
 0x2c7   : > { %1068 = vmatprep.subr.bf16.mxu1 %v1181_v1 }
 0x2c8   : > { %v1069_v20 = vpack.c.bf16 %v767_v18, %v766_v19 }
 0x2ca   : > { %1070 = vmatpush3.bf16.msra.mxu1 %v1069_v20 }
 0x2cd   : > { %1043 = vmatmul.mubr.msk.f32.vlgmr.msra.gmra.mrb[4].mxu1 %vm537_vm1, %v768_v21 }
 0x3a0   : > { %v844_v23 = vpop.f32.mrb[4].mxu1 }
 0x3a1   : > { %v845_v24 = vadd.f32 %v844_v23, %v773_v22  ;;  %v1044_v25 = vpop.f32.mrb[5].mxu1 }
 0x3a3   : > { %v848_v26 = vrot.slane %v845_v24, 4 }
 0x3a5   : > { %v849_v27 = vmax.f32 %v845_v24, %v848_v26 }
 0x3a7   : > { %v850_v28 = vrot.slane %v849_v27, 2 }
 0x3a9   : > { %v851_v30 = vmax.f32 %v849_v27, %v850_v28 }
 0x3ab   : > { %v852_v31 = vrot.slane %v851_v30, 1 }
 0x3ad   : > { %v853_v33 = vmax.f32 %v851_v30, %v852_v31 }
 0x3af   : > { %vm856_vm3 = vcmp.ge.f32.partialorder %v845_v24, %v853_v33 }
 0x3b0   : > { %v857_v34 = vsel %vm856_vm3, %v855_v32, 8 }
 0x3b1   : > { %v858_v35 = vrot.slane %v857_v34, 4 }
 0x3b3   : > { %vm859_vm4 = vcmp.lt.s32.totalorder %v857_v34, %v858_v35 }
 0x3b4   : > { %v860_v36 = vsel %vm859_vm4, %v857_v34, %v858_v35 }
 0x3b5   : > { %v861_v37 = vrot.slane %v860_v36, 2 }
 0x3b7   : > { %vm862_vm5 = vcmp.lt.s32.totalorder %v860_v36, %v861_v37 }
 0x3b8   : > { %v863_v38 = vsel %vm862_vm5, %v860_v36, %v861_v37 }
 0x3b9   : > { %v864_v39 = vrot.slane %v863_v38, 1 }
 0x3bb   : > { %vm865_vm6 = vcmp.lt.s32.totalorder %v863_v38, %v864_v39 }
 0x3bc   : > { %v866_v40 = vsel %vm865_vm6, %v863_v38, %v864_v39 }
 0x3bd   : > { %867 = vst [vmem:[%s374_s29] sm:$0x1] %v866_v40 }
 0x3be   : > { %1129 = shalt.err (!%p1126_p5)
}
 0x3bf   : > { %s1130_s28 = scalar_lea.hbm %s1392_s22, 16  ;;  %s1134_s29 = scalar_lea.hbm %s1445_s9, 32 }
 0x3c0   : > { %p1131_p7 = scmp.ne.s32.totalorder %s1392_s22, %s1130_s28  ;;  %p1135_p12 = scmp.lt.u32.totalorder %s1392_s22, %s1445_s9 }
 0x3c1   : > { %p1136_p13 = scmp.lt.u32.totalorder %s1134_s29, %s1130_s28  ;;  %p1138_p1 = scmp.lt.u32.totalorder %s1130_s28, %s1392_s22 }
 0x3c2   : > { %p1132_p10 = pnand %p1131_p7, %p1273_p6 }
 0x3c3   : > { %p1137_p0 = por %p1136_p13, %p1135_p12 }
 0x3c4   : > { %p1133_p11 = pneg %p1132_p10 }
 0x3c5   : > { %p1139_p2 = por %p1138_p1, %p1137_p0 }
 0x3c7   : > { %p1140_p3 = pnand %p1139_p2, %p1133_p11 }
 0x3c9   : > { %1143 = shalt.err (!%p1140_p3)
}
 0x3ca   : > { %1071 = dma.vmem_to_hbm [thread:$0]  (%p1273_p6), %s1394_s14, 16, %s1392_s22, %s869_s16  }
 0x3cb PF: > { %s893_s23 = sand.u32 1, %s1166_s30   ;;  %p1074_p4 = pnand %p944_p9, %p1277_p8 }
 0x3cc   : > { %s894_s13 = scalar_lea.sflag [#allocation4], %s893_s23 }
 0x3cd   : > { %1161 = dma.done.wait (!%p1074_p4), %s894_s13, 16  }
 0x3ce   : > { %1163 = vsyncadd (!%p1074_p4), %s894_s13, 4294967280  ;;  %p19_p5 = scmp.ge.s32.totalorder %s1258_s15, 4   ;;  %s1448_s30 = smov %s1170_s10 }
 0x3cf   : > { %s1449_s10 = smov %s1174_s11  ;;  %s1450_s11 = smov %s1271_s18 }
 0x3d0   : > { %s1451_s12 = smov %s1258_s15  ;;  %21 = sbr.rel (!%p19_p5) target bundleno = 3 (0x3), region = 137 }
 0x3d7   :  { %898 = vsyncpa [#allocation4], 1 }
 0x3d8   :  { %900 = vsyncpa [#allocation4 + $0x1], 1 }

</bundles_post_ra>
